<compile_context>
chip_gen: v7x
topology: tpu7x:2x2x1
jax: 0.10.0
libtpu: 0.0.40
codegen_flags: <defaults>
</compile_context>

<pallas_src>
import jax
import jax.numpy as jnp
from jax import lax
from jax.experimental import pallas as pl
from jax.experimental.pallas import tpu as pltpu
from functools import partial


# ----------------------------------------------------------------------------
# Kernel 1: forward pass (identity copy of embedded_text), large lane-dense tiles.
# ----------------------------------------------------------------------------
def _forward_copy_kernel(x_ref, o_ref):
    o_ref[...] = x_ref[...]


def _pick_row_tile(rows, row_bytes, max_block_bytes=4 << 20):
    # Largest sublane-aligned divisor of `rows` whose block stays <= ~4 MiB, so
    # 2 input + 2 output double-buffers fit comfortably even in v7x's 64 MiB VMEM.
    for cand in (2048, 1024, 512, 256, 128, 64, 32, 16, 8):
        if rows % cand == 0 and cand * row_bytes <= max_block_bytes:
            return cand
    return rows  # fall back to a single whole-array block (always legal)


def pallas_forward(tokenized_text, embedded_text):
    # Mirrors EmbeddingManager.forward(tokenized_text, embedded_text) -> embedded_text.
    # tokenized_text is unused (as in PyTorch) and deliberately NOT passed to the
    # pallas_call, so no HBM->VMEM DMA is issued for it.
    del tokenized_text
    B, S, D = embedded_text.shape
    rows = B * S
    x = embedded_text.reshape(rows, D)
    tile = _pick_row_tile(rows, D * x.dtype.itemsize)
    out = pl.pallas_call(
        _forward_copy_kernel,
        out_shape=jax.ShapeDtypeStruct((rows, D), x.dtype),
        grid=(rows // tile,),
        in_specs=[pl.BlockSpec((tile, D), lambda i: (i, 0))],
        out_specs=pl.BlockSpec((tile, D), lambda i: (i, 0)),
        # Alias input->output: the copy becomes an in-place pass when the caller
        # donates the buffer; harmless (XLA inserts a copy) otherwise.
        input_output_aliases={0: 0},
        # "parallel" lets v7x shard the row-tile axis across its 2 TensorCores.
        compiler_params=pltpu.CompilerParams(dimension_semantics=("parallel",)),
    )(x)
    return out.reshape(B, S, D)


# ----------------------------------------------------------------------------
# Kernel 2: get_embedding_norms_squared -> (params * params).sum(axis=-1)
#   Output is lane-dense (1, P) instead of (P, 1); input arrives transposed (D, P)
#   (wrapper-side layout plumbing) so no in-kernel transpose is needed.
# ----------------------------------------------------------------------------
def _norms_sq_kernel(pt_ref, o_ref):
    pt = pt_ref[...].astype(jnp.float32)          # (D, P)
    o_ref[...] = jnp.sum(pt * pt, axis=0, keepdims=True)   # (1, P) lane-dense store


def pallas_norms_squared(all_params):
    P, D = all_params.shape
    # TODO(synk): if the learned-parameter table grows large, tile over P/D instead
    # of a single whole-array block.
    out = pl.pallas_call(
        _norms_sq_kernel,
        out_shape=jax.ShapeDtypeStruct((1, P), jnp.float32),
    )(all_params.T)
    return out[0]


# ----------------------------------------------------------------------------
# Kernel 3: embedding_to_coarse_loss
#   sum_k (opt_k - coarse_k) @ (opt_k - coarse_k).T / K, collapsed into one MXU
#   contraction over K*D: opt/coarse are concatenated along features -> (V, K*D).
# ----------------------------------------------------------------------------
def _coarse_loss_kernel(opt_ref, coarse_ref, o_ref, *, inv_num_keys):
    d = opt_ref[...] - coarse_ref[...]            # (V, K*D), fed to MXU in input dtype
    loss = lax.dot_general(d, d, (((1,), (1,)), ((), ())),
                           preferred_element_type=jnp.float32)
    o_ref[...] = loss * inv_num_keys              # single reciprocal-multiply epilogue


def pallas_coarse_loss(optimized_list, coarse_list):
    num_keys = len(optimized_list)
    opt = jnp.concatenate(optimized_list, axis=-1)     # (V, K*D)
    coarse = jnp.concatenate(coarse_list, axis=-1)     # (V, K*D)
    V = opt.shape[0]
    return pl.pallas_call(
        partial(_coarse_loss_kernel, inv_num_keys=1.0 / num_keys),
        out_shape=jax.ShapeDtypeStruct((V, V), jnp.float32),
    )(opt, coarse)


# ----------------------------------------------------------------------------
# EmbeddingManager: deterministic synthetic init (no tokenizer / checkpoint).
# ----------------------------------------------------------------------------
class EmbeddingManager:
    """JAX/Pallas port of ldm.modules.embedding_manager.EmbeddingManager."""

    def __init__(self, placeholder_strings, num_vectors_per_token=1,
                 token_dim=768, seed=0):
        # TODO(synk): the real CLIP/BERT tokenizer + frozen text-encoder embedding lookup
        # used at init time has no Pallas equivalent; placeholder tokens and
        # initializer-word embeddings are synthesized deterministically instead.
        key = jax.random.PRNGKey(seed)
        self.max_vectors_per_token = num_vectors_per_token
        self.token_dim = token_dim
        self.string_to_token_dict = {}
        self.string_to_param_dict = {}
        self.initial_embeddings = {}
        for idx, s in enumerate(placeholder_strings):
            key, k1, k2 = jax.random.split(key, 3)
            self.string_to_token_dict[s] = jnp.int32(1000 + idx)
            init_emb = jax.random.normal(k1, (token_dim,), jnp.float32)
            coarse = jnp.tile(init_emb[None, :], (num_vectors_per_token, 1))
            self.initial_embeddings[s] = coarse
            self.string_to_param_dict[s] = coarse + 0.01 * jax.random.normal(
                k2, (num_vectors_per_token, token_dim), jnp.float32)

    # forward(tokenized_text, embedded_text) -> embedded_text  (via Pallas copy)
    def __call__(self, tokenized_text, embedded_text):
        return pallas_forward(tokenized_text, embedded_text)

    def get_embedding_norms_squared(self):
        all_params = jnp.concatenate(list(self.string_to_param_dict.values()), axis=0)
        return pallas_norms_squared(all_params)

    def embedding_to_coarse_loss(self):
        keys = list(self.initial_embeddings.keys())
        return pallas_coarse_loss(
            [self.string_to_param_dict[k] for k in keys],
            [self.initial_embeddings[k] for k in keys])


# ----------------------------------------------------------------------------
if __name__ == "__main__":
    key = jax.random.PRNGKey(0)
    B, S, D = 2, 8, 768          # batch, seq, token_dim (CLIP branch: 768)
    num_vectors_per_token = 2

    manager = EmbeddingManager(
        placeholder_strings=["*", "&"],
        num_vectors_per_token=num_vectors_per_token,
        token_dim=D,
        seed=0,
    )

    k_tok, k_emb = jax.random.split(key)
    tokenized_text = jax.random.randint(k_tok, (B, S), 0, 49408, dtype=jnp.int32)
    embedded_text = jax.random.normal(k_emb, (B, S, D), jnp.float32)

    # forward: identity pass-through through the Pallas copy kernel
    out = jax.block_until_ready(manager(tokenized_text, embedded_text))
    assert out.shape == embedded_text.shape and out.dtype == embedded_text.dtype
    assert bool(jnp.allclose(out, embedded_text)), "forward must return embedded_text"

    # norms squared (lane-dense reduction kernel)
    norms_sq = jax.block_until_ready(manager.get_embedding_norms_squared())
    all_params = jnp.concatenate(list(manager.string_to_param_dict.values()), 0)
    ref_norms = jnp.sum(all_params * all_params, axis=-1)
    assert norms_sq.shape == ref_norms.shape
    assert bool(jnp.allclose(norms_sq, ref_norms, rtol=1e-5, atol=1e-5))

    # coarse loss (single collapsed MXU contraction)
    loss = jax.block_until_ready(manager.embedding_to_coarse_loss())
    ref_loss = jnp.zeros((num_vectors_per_token, num_vectors_per_token), jnp.float32)
    nkeys = len(manager.initial_embeddings)
    for kname in manager.initial_embeddings:
        diff = manager.string_to_param_dict[kname] - manager.initial_embeddings[kname]
        ref_loss = ref_loss + diff @ diff.T / nkeys
    assert loss.shape == ref_loss.shape
    assert bool(jnp.allclose(loss, ref_loss, rtol=1e-4, atol=1e-5))

    print("KERNEL_OK")
</pallas_src>

<mosaic_0001>
module attributes {stable_mosaic.version = 11 : i64} {
  func.func @_forward_copy_kernel(%arg0: i32, %arg1: memref<16x768xf32, #tpu.memory_space<vmem>>, %arg2: memref<16x768xf32, #tpu.memory_space<vmem>>) attributes {dimension_semantics = [#tpu.dimension_semantics<parallel>], iteration_bounds = array<i64: 1>, scalar_prefetch = 0 : i64, scratch_operands = 0 : i64, tpu.core_type = #tpu.core_type<tc>, window_params = [{transform_indices = @transform_0, window_bounds = array<i64: 16, 768>}, {transform_indices = @transform_1, window_bounds = array<i64: 16, 768>}]} {
    %c0 = arith.constant 0 : index
    %c0_0 = arith.constant 0 : index
    %0 = vector.load %arg1[%c0, %c0_0] : memref<16x768xf32, #tpu.memory_space<vmem>>, vector<16x768xf32>
    %c0_1 = arith.constant 0 : index
    %c0_2 = arith.constant 0 : index
    %1 = vector.load %arg2[%c0_1, %c0_2] : memref<16x768xf32, #tpu.memory_space<vmem>>, vector<16x768xf32>
    tpu.vector_store %arg2[%c0_1, %c0_2], %0 {strides = array<i32>} : memref<16x768xf32, #tpu.memory_space<vmem>>, vector<16x768xf32>,
    return
  }
  func.func @transform_0(%arg0: i32) -> (i32, i32) {
    %c0_i32 = arith.constant 0 : i32
    %c0_i32_0 = arith.constant 0 : i32
    return %arg0, %c0_i32 : i32, i32
  }
  func.func @transform_1(%arg0: i32) -> (i32, i32) {
    %c0_i32 = arith.constant 0 : i32
    %c0_i32_0 = arith.constant 0 : i32
    return %arg0, %c0_i32 : i32, i32
  }
}

</mosaic_0001>

<bundles_post_ra>
// kernel: tpu_custom_call.1
= control target key start
LH: loop header
LB: loop body
LE: loop exit
PB: predicated region body
PF: predicated region fallthrough
CT: control target
= control target key end

     0   :  { %6 = vsyncpa [#allocation3], 0  ;;  %s160_s0 = inlined_call_operand.hbm [shape: f32[16,768], index: 0, kind: input, shape index: {}, may-alias: {0,1}]   ;;  %s161_s1 = inlined_call_operand.hbm [shape: f32[16,768], index: 1, kind: output, shape index: {}, may-alias: {0,1}]  }
   0x1   :  { %7 = vsyncpa [#allocation4], 0  ;;  %s116_s6 = smov [#allocation2]   ;;  %s68_s10 = scalar_lea.hbm %s160_s0, 1536 }
   0x2   :  { %s13_s7 = sshll.u32 %s116_s6, 4  ;;  %p69_p0 = scmp.ne.s32.totalorder %s160_s0, %s68_s10  ;;  %s14_s7 = int_to_ptr.vmem [resolvable:$true] %s13_s7 }
   0x3   :  { %p72_p1 = scmp.lt.u32.totalorder %s68_s10, %s160_s0 }
   0x5   :  { %p74_p2 = pnand %p72_p1, %p69_p0 }
   0x7   :  { %77 = shalt.err (!%p74_p2)
}
   0x8   :  { %s78_s15 = scalar_lea.vmem %s14_s7, 1536  ;;  %p83_p4 = scmp.lt.s32.totalorder %s14_s7, %s14_s7 }
   0x9   :  { %p79_p3 = scmp.ne.s32.totalorder %s14_s7, %s78_s15  ;;  %p84_p5 = scmp.lt.s32.totalorder %s78_s15, %s78_s15 }
   0xb   :  { %p85_p6 = por %p84_p5, %p83_p4 }
   0xd   :  { %p86_p7 = pnand %p85_p6, %p79_p3 }
   0xf   :  { %89 = shalt.err (!%p86_p7)
}
  0x10   :  { %s117_s16 = smov 768   ;;  %s118_s17 = smov 48  }
  0x11   :  { %19 = dma.hbm_to_vmem [thread:$0]  %s160_s0, 1536, %s14_s7, [#allocation3], %s117_s16, %s117_s16, %s118_s17  }
  0x12   :  { %112 = dma.done.wait [#allocation3], 1536  }
  0x13   :  { %113 = vsyncadd [#allocation3], 4294965760  ;;  %s119_s20 = smov [#allocation5]   ;;  %v23_v0 = vld [vmem:[#allocation2] sm:$0xff]  ;;  %v24_v1 = vld [vmem:[#allocation2 + $0x8] sm:$0xff] }
  0x14   :  { %s52_s21 = sshll.u32 %s119_s20, 4  ;;  %v25_v2 = vld [vmem:[#allocation2 + $0x10] sm:$0xff]  ;;  %35 = vst [vmem:[#allocation5] sm:$0xff] %v23_v0  ;;  %36 = vst [vmem:[#allocation5 + $0x8] sm:$0xff] %v24_v1  ;;  %v26_v3 = vld [vmem:[#allocation2 + $0x18] sm:$0xff]  ;;  %s53_s21 = int_to_ptr.vmem [resolvable:$true] %s52_s21 }
  0x15   :  { %37 = vst [vmem:[#allocation5 + $0x10] sm:$0xff] %v25_v2  ;;  %v27_v4 = vld [vmem:[#allocation2 + $0x20] sm:$0xff]  ;;  %v28_v5 = vld [vmem:[#allocation2 + $0x28] sm:$0xff]  ;;  %38 = vst [vmem:[#allocation5 + $0x18] sm:$0xff] %v26_v3  ;;  %s90_s0 = scalar_lea.vmem %s53_s21, 1536  ;;  %p95_p9 = scmp.lt.s32.totalorder %s53_s21, %s53_s21 }
  0x16   :  { %39 = vst [vmem:[#allocation5 + $0x20] sm:$0xff] %v27_v4  ;;  %40 = vst [vmem:[#allocation5 + $0x28] sm:$0xff] %v28_v5  ;;  %v29_v6 = vld [vmem:[#allocation2 + $0x30] sm:$0xff]  ;;  %v30_v7 = vld [vmem:[#allocation2 + $0x38] sm:$0xff]  ;;  %p91_p8 = scmp.ne.s32.totalorder %s53_s21, %s90_s0  ;;  %p96_p10 = scmp.lt.s32.totalorder %s90_s0, %s90_s0 }
  0x17   :  { %v31_v8 = vld [vmem:[#allocation2 + $0x40] sm:$0xff]  ;;  %41 = vst [vmem:[#allocation5 + $0x30] sm:$0xff] %v29_v6  ;;  %42 = vst [vmem:[#allocation5 + $0x38] sm:$0xff] %v30_v7  ;;  %v32_v9 = vld [vmem:[#allocation2 + $0x48] sm:$0xff] }
  0x18   :  { %43 = vst [vmem:[#allocation5 + $0x40] sm:$0xff] %v31_v8  ;;  %v33_v10 = vld [vmem:[#allocation2 + $0x50] sm:$0xff]  ;;  %v34_v11 = vld [vmem:[#allocation2 + $0x58] sm:$0xff]  ;;  %44 = vst [vmem:[#allocation5 + $0x48] sm:$0xff] %v32_v9  ;;  %p97_p11 = por %p96_p10, %p95_p9 }
  0x19   :  { %45 = vst [vmem:[#allocation5 + $0x50] sm:$0xff] %v33_v10  ;;  %46 = vst [vmem:[#allocation5 + $0x58] sm:$0xff] %v34_v11 }
  0x1a   :  { %p98_p12 = pnand %p97_p11, %p91_p8 }
  0x1c   :  { %101 = shalt.err (!%p98_p12)
}
  0x1d   :  { %s102_s24 = scalar_lea.hbm %s161_s1, 1536 }
  0x1e   :  { %p103_p13 = scmp.ne.s32.totalorder %s161_s1, %s102_s24  ;;  %p106_p0 = scmp.lt.u32.totalorder %s102_s24, %s161_s1 }
  0x20   :  { %p108_p1 = pnand %p106_p0, %p103_p13 }
  0x22   :  { %111 = shalt.err (!%p108_p1)
}
  0x23   :  { %58 = dma.vmem_to_hbm [thread:$0]  %s53_s21, 1536, %s161_s1, [#allocation4], %s117_s16, %s117_s16, %s118_s17  }
  0x24   :  { %114 = dma.done.wait [#allocation4], 1536  }
  0x25   :  { %115 = vsyncadd [#allocation4], 4294965760 }
  0x26   :  { %62 = vsyncpa [#allocation3], 1 }
  0x27   :  { %63 = vsyncpa [#allocation4], 1 }

</bundles_post_ra>
